<compile_context>
chip_gen: v6e
topology: v6e:2x2x1
jax: 0.10.0
libtpu: 0.0.40
codegen_flags: <defaults>
</compile_context>

<pallas_src>
import functools

import jax
import jax.numpy as jnp
from jax.experimental import pallas as pl
from jax.experimental.pallas import tpu as pltpu


def _layernorm(x, gamma, beta, eps=1e-6):
    mean = jnp.mean(x, axis=-1, keepdims=True)
    centered = x - mean
    var = jnp.mean(centered * centered, axis=-1, keepdims=True)
    inv = jax.lax.rsqrt(var + eps)
    return centered * inv * gamma + beta


def _decoder_layer_kernel(x_ref, wq_ref, wk_ref, wv_ref, wo_ref,
                          ln1_g_ref, ln1_b_ref,
                          w1_ref, b1_ref, w2_ref, b2_ref,
                          ln2_g_ref, ln2_b_ref,
                          out_ref, *, num_heads):
    # x_ref: (S, H)  (batch dim squeezed by BlockSpec)
    x = x_ref[...].astype(jnp.float32)
    s = x.shape[0]

    q = jnp.dot(x, wq_ref[...], preferred_element_type=jnp.float32)   # (S, KD)
    k = jnp.dot(x, wk_ref[...], preferred_element_type=jnp.float32)   # (S, KD)
    v = jnp.dot(x, wv_ref[...], preferred_element_type=jnp.float32)   # (S, VD)

    kd = q.shape[-1]
    vd = v.shape[-1]
    dk = kd // num_heads
    dv = vd // num_heads
    scale = dk ** -0.5

    # Causal bias, equivalent to -1e9 * triu(ones(S, S), 1).
    row = jax.lax.broadcasted_iota(jnp.int32, (s, s), 0)
    col = jax.lax.broadcasted_iota(jnp.int32, (s, s), 1)
    bias = jnp.where(col > row, jnp.float32(-1e9), jnp.float32(0.0))

    head_outs = []
    for h in range(num_heads):  # static loop, num_heads is small
        qh = q[:, h * dk:(h + 1) * dk] * scale          # (S, dk)
        kh = k[:, h * dk:(h + 1) * dk]                  # (S, dk)
        vh = v[:, h * dv:(h + 1) * dv]                  # (S, dv)
        # logits[q, k] = sum_d q[q, d] * k[k, d]   (= q @ k.T, no transpose op)
        logits = jax.lax.dot_general(
            qh, kh, (((1,), (1,)), ((), ())),
            preferred_element_type=jnp.float32) + bias   # (S, S)
        m = jnp.max(logits, axis=-1, keepdims=True)
        e = jnp.exp(logits - m)
        w = e / jnp.sum(e, axis=-1, keepdims=True)
        head_outs.append(
            jnp.dot(w, vh, preferred_element_type=jnp.float32))  # (S, dv)

    attn_cat = jnp.concatenate(head_outs, axis=-1)                   # (S, VD)
    attn_out = jnp.dot(attn_cat, wo_ref[...],
                       preferred_element_type=jnp.float32)           # (S, H)

    # Residual + LayerNorm (dropout = identity in eval mode).
    x1 = _layernorm(attn_out + x, ln1_g_ref[...], ln1_b_ref[...])

    # FFN: Linear -> ReLU -> Linear.
    h1 = jnp.maximum(
        jnp.dot(x1, w1_ref[...], preferred_element_type=jnp.float32)
        + b1_ref[...], 0.0)
    ffn_out = (jnp.dot(h1, w2_ref[...], preferred_element_type=jnp.float32)
               + b2_ref[...])

    out = _layernorm(ffn_out + x1, ln2_g_ref[...], ln2_b_ref[...])
    out_ref[...] = out.astype(out_ref.dtype)


def decoder_layer_forward(X, params, *, num_heads):
    """Fused DecoderLayer forward. X: (B, S, H); weights are (in, out)."""
    B, S, H = X.shape
    wq, wk, wv, wo = params["wq"], params["wk"], params["wv"], params["wo"]
    w1, b1, w2, b2 = params["w1"], params["b1"], params["w2"], params["b2"]
    ln1_g, ln1_b = params["ln1_g"], params["ln1_b"]
    ln2_g, ln2_b = params["ln2_g"], params["ln2_b"]
    KD, VD, F = wq.shape[1], wv.shape[1], w1.shape[1]

    def const_spec(arr):
        # Full-array block, resident across all grid steps.
        return pl.BlockSpec(arr.shape, lambda b: (0, 0))

    flops = B * (2 * S * H * (2 * KD + VD)        # q/k/v projections
                 + 2 * S * S * (KD + VD)          # logits + weights@v
                 + 2 * S * VD * H                 # output projection
                 + 4 * S * H * F)                 # FFN
    transcendentals = B * (num_heads * S * S + 2 * S)
    bytes_accessed = 4 * (2 * B * S * H
                          + 2 * H * KD + H * VD + VD * H
                          + 2 * H * F + F + 5 * H)

    grid_spec = pltpu.PrefetchScalarGridSpec(
        num_scalar_prefetch=0,
        grid=(B,),
        in_specs=[
            pl.BlockSpec((None, S, H), lambda b: (b, 0, 0)),
            const_spec(wq), const_spec(wk), const_spec(wv), const_spec(wo),
            const_spec(ln1_g), const_spec(ln1_b),
            const_spec(w1), const_spec(b1), const_spec(w2), const_spec(b2),
            const_spec(ln2_g), const_spec(ln2_b),
        ],
        out_specs=pl.BlockSpec((None, S, H), lambda b: (b, 0, 0)),
    )

    return pl.pallas_call(
        functools.partial(_decoder_layer_kernel, num_heads=num_heads),
        out_shape=jax.ShapeDtypeStruct((B, S, H), X.dtype),
        grid_spec=grid_spec,
        compiler_params=pltpu.CompilerParams(
            dimension_semantics=("parallel",)),
        cost_estimate=pl.CostEstimate(
            flops=flops,
            transcendentals=transcendentals,
            bytes_accessed=bytes_accessed),
    )(X, wq, wk, wv, wo, ln1_g, ln1_b, w1, b1, w2, b2, ln2_g, ln2_b)


def decoder_layer_reference(X, params, *, num_heads):
    """Pure-JAX mirror of the PyTorch DecoderLayer (global attn, eval mode)."""
    B, S, H = X.shape
    q = X @ params["wq"]
    k = X @ params["wk"]
    v = X @ params["wv"]
    KD, VD = q.shape[-1], v.shape[-1]
    dk, dv = KD // num_heads, VD // num_heads

    def split(t, d):
        return t.reshape(B, S, num_heads, d).transpose(0, 2, 1, 3)

    q = split(q, dk) * dk ** -0.5
    k = split(k, dk)
    v = split(v, dv)
    logits = jnp.einsum("bhkd,bhqd->bhqk", k, q)
    bias = -1e9 * jnp.triu(jnp.ones((S, S), jnp.float32), 1)
    weights = jax.nn.softmax(logits + bias, axis=-1)
    out = weights @ v                                   # (B, nh, S, dv)
    out = out.transpose(0, 2, 1, 3).reshape(B, S, VD)
    attn = out @ params["wo"]

    def ln(x, g, b):
        m = x.mean(-1, keepdims=True)
        var = ((x - m) ** 2).mean(-1, keepdims=True)
        return (x - m) / jnp.sqrt(var + 1e-6) * g + b

    x1 = ln(attn + X, params["ln1_g"], params["ln1_b"])
    h1 = jax.nn.relu(x1 @ params["w1"] + params["b1"])
    ffn = h1 @ params["w2"] + params["b2"]
    return ln(ffn + x1, params["ln2_g"], params["ln2_b"])


def init_params(key, H, KD, VD, F):
    ks = jax.random.split(key, 12)

    def w(k, fan_in, shape):
        return jax.random.normal(k, shape, jnp.float32) / jnp.sqrt(fan_in)

    return dict(
        wq=w(ks[0], H, (H, KD)),
        wk=w(ks[1], H, (H, KD)),
        wv=w(ks[2], H, (H, VD)),
        wo=w(ks[3], VD, (VD, H)),
        w1=w(ks[4], H, (H, F)),
        b1=0.01 * jax.random.normal(ks[5], (1, F), jnp.float32),
        w2=w(ks[6], F, (F, H)),
        b2=0.01 * jax.random.normal(ks[7], (1, H), jnp.float32),
        ln1_g=1.0 + 0.1 * jax.random.normal(ks[8], (1, H), jnp.float32),
        ln1_b=0.1 * jax.random.normal(ks[9], (1, H), jnp.float32),
        ln2_g=1.0 + 0.1 * jax.random.normal(ks[10], (1, H), jnp.float32),
        ln2_b=0.1 * jax.random.normal(ks[11], (1, H), jnp.float32),
    )


if __name__ == "__main__":
    key = jax.random.PRNGKey(0)
    # hparams: hidden_size=32, num_heads=4, total_key_depth=32,
    #          total_value_depth=32, filter_size=64, dropout=0, attn_type='global'
    B, S, H = 2, 8, 32
    num_heads, KD, VD, F = 4, 32, 32, 64

    kx, kp = jax.random.split(key)
    X = jax.random.normal(kx, (B, S, H), jnp.float32)
    params = init_params(kp, H, KD, VD, F)

    out = decoder_layer_forward(X, params, num_heads=num_heads)
    out = jax.block_until_ready(out)

    ref = decoder_layer_reference(X, params, num_heads=num_heads)

    assert out.shape == (B, S, H)
    max_err = float(jnp.max(jnp.abs(out - ref)))
    assert jnp.allclose(out, ref, atol=1e-4, rtol=1e-4), max_err

    print("KERNEL_OK")
</pallas_src>

<mosaic_0001>
module attributes {stable_mosaic.version = 11 : i64} {
  func.func @_decoder_layer_kernel(%arg0: i32, %arg1: memref<1x8x32xf32, #tpu.memory_space<vmem>>, %arg2: memref<32x32xf32, #tpu.memory_space<vmem>>, %arg3: memref<32x32xf32, #tpu.memory_space<vmem>>, %arg4: memref<32x32xf32, #tpu.memory_space<vmem>>, %arg5: memref<32x32xf32, #tpu.memory_space<vmem>>, %arg6: memref<1x32xf32, #tpu.memory_space<vmem>>, %arg7: memref<1x32xf32, #tpu.memory_space<vmem>>, %arg8: memref<32x64xf32, #tpu.memory_space<vmem>>, %arg9: memref<1x64xf32, #tpu.memory_space<vmem>>, %arg10: memref<64x32xf32, #tpu.memory_space<vmem>>, %arg11: memref<1x32xf32, #tpu.memory_space<vmem>>, %arg12: memref<1x32xf32, #tpu.memory_space<vmem>>, %arg13: memref<1x32xf32, #tpu.memory_space<vmem>>, %arg14: memref<1x8x32xf32, #tpu.memory_space<vmem>>) attributes {dimension_semantics = [#tpu.dimension_semantics<parallel>], iteration_bounds = array<i64: 2>, scalar_prefetch = 0 : i64, scratch_operands = 0 : i64, tpu.core_type = #tpu.core_type<tc>, window_params = [{transform_indices = @transform_0, window_bounds = array<i64: 1, 8, 32>}, {pipeline_mode = #tpu.pipeline_mode<synchronous>, transform_indices = @transform_1, window_bounds = array<i64: 32, 32>}, {pipeline_mode = #tpu.pipeline_mode<synchronous>, transform_indices = @transform_2, window_bounds = array<i64: 32, 32>}, {pipeline_mode = #tpu.pipeline_mode<synchronous>, transform_indices = @transform_3, window_bounds = array<i64: 32, 32>}, {pipeline_mode = #tpu.pipeline_mode<synchronous>, transform_indices = @transform_4, window_bounds = array<i64: 32, 32>}, {pipeline_mode = #tpu.pipeline_mode<synchronous>, transform_indices = @transform_5, window_bounds = array<i64: 1, 32>}, {pipeline_mode = #tpu.pipeline_mode<synchronous>, transform_indices = @transform_6, window_bounds = array<i64: 1, 32>}, {pipeline_mode = #tpu.pipeline_mode<synchronous>, transform_indices = @transform_7, window_bounds = array<i64: 32, 64>}, {pipeline_mode = #tpu.pipeline_mode<synchronous>, transform_indices = @transform_8, window_bounds = array<i64: 1, 64>}, {pipeline_mode = #tpu.pipeline_mode<synchronous>, transform_indices = @transform_9, window_bounds = array<i64: 64, 32>}, {pipeline_mode = #tpu.pipeline_mode<synchronous>, transform_indices = @transform_10, window_bounds = array<i64: 1, 32>}, {pipeline_mode = #tpu.pipeline_mode<synchronous>, transform_indices = @transform_11, window_bounds = array<i64: 1, 32>}, {pipeline_mode = #tpu.pipeline_mode<synchronous>, transform_indices = @transform_12, window_bounds = array<i64: 1, 32>}, {transform_indices = @transform_13, window_bounds = array<i64: 1, 8, 32>}]} {
    %c0 = arith.constant 0 : index
    %c0_0 = arith.constant 0 : index
    %c0_1 = arith.constant 0 : index
    %0 = vector.load %arg1[%c0, %c0_0, %c0_1] : memref<1x8x32xf32, #tpu.memory_space<vmem>>, vector<1x8x32xf32>
    %1 = vector.shape_cast %0 : vector<1x8x32xf32> to vector<8x32xf32>
    %c0_2 = arith.constant 0 : index
    %c0_3 = arith.constant 0 : index
    %2 = vector.load %arg2[%c0_2, %c0_3] : memref<32x32xf32, #tpu.memory_space<vmem>>, vector<32x32xf32>
    %cst = arith.constant dense<0.000000e+00> : vector<8x32xf32>
    %3 = tpu.matmul %1, %2, %cst {dimension_numbers = #tpu.dot_dimension_numbers<[1], [0], [0], [1], [0, 0, 1, 1], [], []>} : vector<8x32xf32>, vector<32x32xf32>, vector<8x32xf32> -> vector<8x32xf32>
    %c0_4 = arith.constant 0 : index
    %c0_5 = arith.constant 0 : index
    %4 = vector.load %arg3[%c0_4, %c0_5] : memref<32x32xf32, #tpu.memory_space<vmem>>, vector<32x32xf32>
    %cst_6 = arith.constant dense<0.000000e+00> : vector<8x32xf32>
    %5 = tpu.matmul %1, %4, %cst_6 {dimension_numbers = #tpu.dot_dimension_numbers<[1], [0], [0], [1], [0, 0, 1, 1], [], []>} : vector<8x32xf32>, vector<32x32xf32>, vector<8x32xf32> -> vector<8x32xf32>
    %c0_7 = arith.constant 0 : index
    %c0_8 = arith.constant 0 : index
    %6 = vector.load %arg4[%c0_7, %c0_8] : memref<32x32xf32, #tpu.memory_space<vmem>>, vector<32x32xf32>
    %cst_9 = arith.constant dense<0.000000e+00> : vector<8x32xf32>
    %7 = tpu.matmul %1, %6, %cst_9 {dimension_numbers = #tpu.dot_dimension_numbers<[1], [0], [0], [1], [0, 0, 1, 1], [], []>} : vector<8x32xf32>, vector<32x32xf32>, vector<8x32xf32> -> vector<8x32xf32>
    %8 = tpu.iota {dimensions = array<i32: 0>} : vector<8x8xi32>
    %9 = tpu.iota {dimensions = array<i32: 1>} : vector<8x8xi32>
    %10 = arith.cmpi sgt, %9, %8 : vector<8x8xi32>
    %cst_10 = arith.constant -1.000000e+09 : f32
    %cst_11 = arith.constant 0.000000e+00 : f32
    %11 = vector.broadcast %cst_10 : f32 to vector<8x8xf32>
    %12 = vector.broadcast %cst_11 : f32 to vector<8x8xf32>
    %13 = arith.select %10, %11, %12 : vector<8x8xi1>, vector<8x8xf32>
    %14 = vector.extract_strided_slice %3 {offsets = [0, 0], sizes = [8, 8], strides = [1, 1]} : vector<8x32xf32> to vector<8x8xf32>
    %cst_12 = arith.constant 0.353553385 : f32
    %15 = vector.broadcast %cst_12 : f32 to vector<8x8xf32>
    %16 = arith.mulf %14, %15 : vector<8x8xf32>
    %17 = vector.extract_strided_slice %5 {offsets = [0, 0], sizes = [8, 8], strides = [1, 1]} : vector<8x32xf32> to vector<8x8xf32>
    %18 = vector.extract_strided_slice %7 {offsets = [0, 0], sizes = [8, 8], strides = [1, 1]} : vector<8x32xf32> to vector<8x8xf32>
    %cst_13 = arith.constant dense<0.000000e+00> : vector<8x8xf32>
    %19 = tpu.matmul %16, %17, %cst_13 {dimension_numbers = #tpu.dot_dimension_numbers<[1], [1], [0], [0], [0, 0, 1, 0], [], []>} : vector<8x8xf32>, vector<8x8xf32>, vector<8x8xf32> -> vector<8x8xf32>
    %20 = arith.addf %19, %13 : vector<8x8xf32>
    %cst_14 = arith.constant dense<0xFF800000> : vector<8xf32>
    %21 = vector.multi_reduction <maximumf>, %20, %cst_14 [1] : vector<8x8xf32> to vector<8xf32>
    %22 = vector.shape_cast %21 : vector<8xf32> to vector<8x1xf32>
    %23 = vector.broadcast %22 : vector<8x1xf32> to vector<8x8xf32>
    %24 = arith.subf %20, %23 : vector<8x8xf32>
    %25 = math.exp %24 : vector<8x8xf32>
    %cst_15 = arith.constant dense<0.000000e+00> : vector<8xf32>
    %26 = vector.multi_reduction <add>, %25, %cst_15 [1] : vector<8x8xf32> to vector<8xf32>
    %27 = vector.shape_cast %26 : vector<8xf32> to vector<8x1xf32>
    %28 = vector.broadcast %27 : vector<8x1xf32> to vector<8x8xf32>
    %29 = arith.divf %25, %28 : vector<8x8xf32>
    %cst_16 = arith.constant dense<0.000000e+00> : vector<8x8xf32>
    %30 = tpu.matmul %29, %18, %cst_16 {dimension_numbers = #tpu.dot_dimension_numbers<[1], [0], [0], [1], [0, 0, 1, 1], [], []>} : vector<8x8xf32>, vector<8x8xf32>, vector<8x8xf32> -> vector<8x8xf32>
    %31 = vector.extract_strided_slice %3 {offsets = [0, 8], sizes = [8, 8], strides = [1, 1]} : vector<8x32xf32> to vector<8x8xf32>
    %cst_17 = arith.constant 0.353553385 : f32
    %32 = vector.broadcast %cst_17 : f32 to vector<8x8xf32>
    %33 = arith.mulf %31, %32 : vector<8x8xf32>
    %34 = vector.extract_strided_slice %5 {offsets = [0, 8], sizes = [8, 8], strides = [1, 1]} : vector<8x32xf32> to vector<8x8xf32>
    %35 = vector.extract_strided_slice %7 {offsets = [0, 8], sizes = [8, 8], strides = [1, 1]} : vector<8x32xf32> to vector<8x8xf32>
    %cst_18 = arith.constant dense<0.000000e+00> : vector<8x8xf32>
    %36 = tpu.matmul %33, %34, %cst_18 {dimension_numbers = #tpu.dot_dimension_numbers<[1], [1], [0], [0], [0, 0, 1, 0], [], []>} : vector<8x8xf32>, vector<8x8xf32>, vector<8x8xf32> -> vector<8x8xf32>
    %37 = arith.addf %36, %13 : vector<8x8xf32>
    %cst_19 = arith.constant dense<0xFF800000> : vector<8xf32>
    %38 = vector.multi_reduction <maximumf>, %37, %cst_19 [1] : vector<8x8xf32> to vector<8xf32>
    %39 = vector.shape_cast %38 : vector<8xf32> to vector<8x1xf32>
    %40 = vector.broadcast %39 : vector<8x1xf32> to vector<8x8xf32>
    %41 = arith.subf %37, %40 : vector<8x8xf32>
    %42 = math.exp %41 : vector<8x8xf32>
    %cst_20 = arith.constant dense<0.000000e+00> : vector<8xf32>
    %43 = vector.multi_reduction <add>, %42, %cst_20 [1] : vector<8x8xf32> to vector<8xf32>
    %44 = vector.shape_cast %43 : vector<8xf32> to vector<8x1xf32>
    %45 = vector.broadcast %44 : vector<8x1xf32> to vector<8x8xf32>
    %46 = arith.divf %42, %45 : vector<8x8xf32>
    %cst_21 = arith.constant dense<0.000000e+00> : vector<8x8xf32>
    %47 = tpu.matmul %46, %35, %cst_21 {dimension_numbers = #tpu.dot_dimension_numbers<[1], [0], [0], [1], [0, 0, 1, 1], [], []>} : vector<8x8xf32>, vector<8x8xf32>, vector<8x8xf32> -> vector<8x8xf32>
    %48 = vector.extract_strided_slice %3 {offsets = [0, 16], sizes = [8, 8], strides = [1, 1]} : vector<8x32xf32> to vector<8x8xf32>
    %cst_22 = arith.constant 0.353553385 : f32
    %49 = vector.broadcast %cst_22 : f32 to vector<8x8xf32>
    %50 = arith.mulf %48, %49 : vector<8x8xf32>
    %51 = vector.extract_strided_slice %5 {offsets = [0, 16], sizes = [8, 8], strides = [1, 1]} : vector<8x32xf32> to vector<8x8xf32>
    %52 = vector.extract_strided_slice %7 {offsets = [0, 16], sizes = [8, 8], strides = [1, 1]} : vector<8x32xf32> to vector<8x8xf32>
    %cst_23 = arith.constant dense<0.000000e+00> : vector<8x8xf32>
    %53 = tpu.matmul %50, %51, %cst_23 {dimension_numbers = #tpu.dot_dimension_numbers<[1], [1], [0], [0], [0, 0, 1, 0], [], []>} : vector<8x8xf32>, vector<8x8xf32>, vector<8x8xf32> -> vector<8x8xf32>
    %54 = arith.addf %53, %13 : vector<8x8xf32>
    %cst_24 = arith.constant dense<0xFF800000> : vector<8xf32>
    %55 = vector.multi_reduction <maximumf>, %54, %cst_24 [1] : vector<8x8xf32> to vector<8xf32>
    %56 = vector.shape_cast %55 : vector<8xf32> to vector<8x1xf32>
    %57 = vector.broadcast %56 : vector<8x1xf32> to vector<8x8xf32>
    %58 = arith.subf %54, %57 : vector<8x8xf32>
    %59 = math.exp %58 : vector<8x8xf32>
    %cst_25 = arith.constant dense<0.000000e+00> : vector<8xf32>
    %60 = vector.multi_reduction <add>, %59, %cst_25 [1] : vector<8x8xf32> to vector<8xf32>
    %61 = vector.shape_cast %60 : vector<8xf32> to vector<8x1xf32>
    %62 = vector.broadcast %61 : vector<8x1xf32> to vector<8x8xf32>
    %63 = arith.divf %59, %62 : vector<8x8xf32>
    %cst_26 = arith.constant dense<0.000000e+00> : vector<8x8xf32>
    %64 = tpu.matmul %63, %52, %cst_26 {dimension_numbers = #tpu.dot_dimension_numbers<[1], [0], [0], [1], [0, 0, 1, 1], [], []>} : vector<8x8xf32>, vector<8x8xf32>, vector<8x8xf32> -> vector<8x8xf32>
    %65 = vector.extract_strided_slice %3 {offsets = [0, 24], sizes = [8, 8], strides = [1, 1]} : vector<8x32xf32> to vector<8x8xf32>
    %cst_27 = arith.constant 0.353553385 : f32
    %66 = vector.broadcast %cst_27 : f32 to vector<8x8xf32>
    %67 = arith.mulf %65, %66 : vector<8x8xf32>
    %68 = vector.extract_strided_slice %5 {offsets = [0, 24], sizes = [8, 8], strides = [1, 1]} : vector<8x32xf32> to vector<8x8xf32>
    %69 = vector.extract_strided_slice %7 {offsets = [0, 24], sizes = [8, 8], strides = [1, 1]} : vector<8x32xf32> to vector<8x8xf32>
    %cst_28 = arith.constant dense<0.000000e+00> : vector<8x8xf32>
    %70 = tpu.matmul %67, %68, %cst_28 {dimension_numbers = #tpu.dot_dimension_numbers<[1], [1], [0], [0], [0, 0, 1, 0], [], []>} : vector<8x8xf32>, vector<8x8xf32>, vector<8x8xf32> -> vector<8x8xf32>
    %71 = arith.addf %70, %13 : vector<8x8xf32>
    %cst_29 = arith.constant dense<0xFF800000> : vector<8xf32>
    %72 = vector.multi_reduction <maximumf>, %71, %cst_29 [1] : vector<8x8xf32> to vector<8xf32>
    %73 = vector.shape_cast %72 : vector<8xf32> to vector<8x1xf32>
    %74 = vector.broadcast %73 : vector<8x1xf32> to vector<8x8xf32>
    %75 = arith.subf %71, %74 : vector<8x8xf32>
    %76 = math.exp %75 : vector<8x8xf32>
    %cst_30 = arith.constant dense<0.000000e+00> : vector<8xf32>
    %77 = vector.multi_reduction <add>, %76, %cst_30 [1] : vector<8x8xf32> to vector<8xf32>
    %78 = vector.shape_cast %77 : vector<8xf32> to vector<8x1xf32>
    %79 = vector.broadcast %78 : vector<8x1xf32> to vector<8x8xf32>
    %80 = arith.divf %76, %79 : vector<8x8xf32>
    %cst_31 = arith.constant dense<0.000000e+00> : vector<8x8xf32>
    %81 = tpu.matmul %80, %69, %cst_31 {dimension_numbers = #tpu.dot_dimension_numbers<[1], [0], [0], [1], [0, 0, 1, 1], [], []>} : vector<8x8xf32>, vector<8x8xf32>, vector<8x8xf32> -> vector<8x8xf32>
    %82 = tpu.concatenate %30, %47, %64, %81 in 1 : vector<8x8xf32>, vector<8x8xf32>, vector<8x8xf32>, vector<8x8xf32> -> vector<8x32xf32>
    %c0_32 = arith.constant 0 : index
    %c0_33 = arith.constant 0 : index
    %83 = vector.load %arg5[%c0_32, %c0_33] : memref<32x32xf32, #tpu.memory_space<vmem>>, vector<32x32xf32>
    %cst_34 = arith.constant dense<0.000000e+00> : vector<8x32xf32>
    %84 = tpu.matmul %82, %83, %cst_34 {dimension_numbers = #tpu.dot_dimension_numbers<[1], [0], [0], [1], [0, 0, 1, 1], [], []>} : vector<8x32xf32>, vector<32x32xf32>, vector<8x32xf32> -> vector<8x32xf32>
    %85 = arith.addf %84, %1 : vector<8x32xf32>
    %c0_35 = arith.constant 0 : index
    %c0_36 = arith.constant 0 : index
    %86 = vector.load %arg6[%c0_35, %c0_36] : memref<1x32xf32, #tpu.memory_space<vmem>>, vector<1x32xf32>
    %c0_37 = arith.constant 0 : index
    %c0_38 = arith.constant 0 : index
    %87 = vector.load %arg7[%c0_37, %c0_38] : memref<1x32xf32, #tpu.memory_space<vmem>>, vector<1x32xf32>
    %cst_39 = arith.constant dense<0.000000e+00> : vector<8xf32>
    %88 = vector.multi_reduction <add>, %85, %cst_39 [1] : vector<8x32xf32> to vector<8xf32>
    %89 = vector.shape_cast %88 : vector<8xf32> to vector<8x1xf32>
    %cst_40 = arith.constant 3.200000e+01 : f32
    %90 = vector.broadcast %cst_40 : f32 to vector<8x1xf32>
    %91 = arith.divf %89, %90 : vector<8x1xf32>
    %92 = vector.broadcast %91 : vector<8x1xf32> to vector<8x32xf32>
    %93 = arith.subf %85, %92 : vector<8x32xf32>
    %94 = arith.mulf %93, %93 : vector<8x32xf32>
    %cst_41 = arith.constant dense<0.000000e+00> : vector<8xf32>
    %95 = vector.multi_reduction <add>, %94, %cst_41 [1] : vector<8x32xf32> to vector<8xf32>
    %96 = vector.shape_cast %95 : vector<8xf32> to vector<8x1xf32>
    %cst_42 = arith.constant 3.200000e+01 : f32
    %97 = vector.broadcast %cst_42 : f32 to vector<8x1xf32>
    %98 = arith.divf %96, %97 : vector<8x1xf32>
    %cst_43 = arith.constant 9.99999997E-7 : f32
    %99 = vector.broadcast %cst_43 : f32 to vector<8x1xf32>
    %100 = arith.addf %98, %99 : vector<8x1xf32>
    %101 = math.rsqrt %100 : vector<8x1xf32>
    %102 = vector.broadcast %101 : vector<8x1xf32> to vector<8x32xf32>
    %103 = arith.mulf %93, %102 : vector<8x32xf32>
    %104 = vector.broadcast %86 : vector<1x32xf32> to vector<8x32xf32>
    %105 = arith.mulf %103, %104 : vector<8x32xf32>
    %106 = vector.broadcast %87 : vector<1x32xf32> to vector<8x32xf32>
    %107 = arith.addf %105, %106 : vector<8x32xf32>
    %c0_44 = arith.constant 0 : index
    %c0_45 = arith.constant 0 : index
    %108 = vector.load %arg8[%c0_44, %c0_45] : memref<32x64xf32, #tpu.memory_space<vmem>>, vector<32x64xf32>
    %cst_46 = arith.constant dense<0.000000e+00> : vector<8x64xf32>
    %109 = tpu.matmul %107, %108, %cst_46 {dimension_numbers = #tpu.dot_dimension_numbers<[1], [0], [0], [1], [0, 0, 1, 1], [], []>} : vector<8x32xf32>, vector<32x64xf32>, vector<8x64xf32> -> vector<8x64xf32>
    %c0_47 = arith.constant 0 : index
    %c0_48 = arith.constant 0 : index
    %110 = vector.load %arg9[%c0_47, %c0_48] : memref<1x64xf32, #tpu.memory_space<vmem>>, vector<1x64xf32>
    %111 = vector.broadcast %110 : vector<1x64xf32> to vector<8x64xf32>
    %112 = arith.addf %109, %111 : vector<8x64xf32>
    %cst_49 = arith.constant 0.000000e+00 : f32
    %113 = vector.broadcast %cst_49 : f32 to vector<8x64xf32>
    %114 = arith.maximumf %112, %113 : vector<8x64xf32>
    %c0_50 = arith.constant 0 : index
    %c0_51 = arith.constant 0 : index
    %115 = vector.load %arg10[%c0_50, %c0_51] : memref<64x32xf32, #tpu.memory_space<vmem>>, vector<64x32xf32>
    %cst_52 = arith.constant dense<0.000000e+00> : vector<8x32xf32>
    %116 = tpu.matmul %114, %115, %cst_52 {dimension_numbers = #tpu.dot_dimension_numbers<[1], [0], [0], [1], [0, 0, 1, 1], [], []>} : vector<8x64xf32>, vector<64x32xf32>, vector<8x32xf32> -> vector<8x32xf32>
    %c0_53 = arith.constant 0 : index
    %c0_54 = arith.constant 0 : index
    %117 = vector.load %arg11[%c0_53, %c0_54] : memref<1x32xf32, #tpu.memory_space<vmem>>, vector<1x32xf32>
    %118 = vector.broadcast %117 : vector<1x32xf32> to vector<8x32xf32>
    %119 = arith.addf %116, %118 : vector<8x32xf32>
    %120 = arith.addf %119, %107 : vector<8x32xf32>
    %c0_55 = arith.constant 0 : index
    %c0_56 = arith.constant 0 : index
    %121 = vector.load %arg12[%c0_55, %c0_56] : memref<1x32xf32, #tpu.memory_space<vmem>>, vector<1x32xf32>
    %c0_57 = arith.constant 0 : index
    %c0_58 = arith.constant 0 : index
    %122 = vector.load %arg13[%c0_57, %c0_58] : memref<1x32xf32, #tpu.memory_space<vmem>>, vector<1x32xf32>
    %cst_59 = arith.constant dense<0.000000e+00> : vector<8xf32>
    %123 = vector.multi_reduction <add>, %120, %cst_59 [1] : vector<8x32xf32> to vector<8xf32>
    %124 = vector.shape_cast %123 : vector<8xf32> to vector<8x1xf32>
    %cst_60 = arith.constant 3.200000e+01 : f32
    %125 = vector.broadcast %cst_60 : f32 to vector<8x1xf32>
    %126 = arith.divf %124, %125 : vector<8x1xf32>
    %127 = vector.broadcast %126 : vector<8x1xf32> to vector<8x32xf32>
    %128 = arith.subf %120, %127 : vector<8x32xf32>
    %129 = arith.mulf %128, %128 : vector<8x32xf32>
    %cst_61 = arith.constant dense<0.000000e+00> : vector<8xf32>
    %130 = vector.multi_reduction <add>, %129, %cst_61 [1] : vector<8x32xf32> to vector<8xf32>
    %131 = vector.shape_cast %130 : vector<8xf32> to vector<8x1xf32>
    %cst_62 = arith.constant 3.200000e+01 : f32
    %132 = vector.broadcast %cst_62 : f32 to vector<8x1xf32>
    %133 = arith.divf %131, %132 : vector<8x1xf32>
    %cst_63 = arith.constant 9.99999997E-7 : f32
    %134 = vector.broadcast %cst_63 : f32 to vector<8x1xf32>
    %135 = arith.addf %133, %134 : vector<8x1xf32>
    %136 = math.rsqrt %135 : vector<8x1xf32>
    %137 = vector.broadcast %136 : vector<8x1xf32> to vector<8x32xf32>
    %138 = arith.mulf %128, %137 : vector<8x32xf32>
    %139 = vector.broadcast %121 : vector<1x32xf32> to vector<8x32xf32>
    %140 = arith.mulf %138, %139 : vector<8x32xf32>
    %141 = vector.broadcast %122 : vector<1x32xf32> to vector<8x32xf32>
    %142 = arith.addf %140, %141 : vector<8x32xf32>
    %c0_64 = arith.constant 0 : index
    %c0_65 = arith.constant 0 : index
    %c0_66 = arith.constant 0 : index
    %143 = vector.load %arg14[%c0_64, %c0_65, %c0_66] : memref<1x8x32xf32, #tpu.memory_space<vmem>>, vector<1x8x32xf32>
    %144 = vector.shape_cast %143 : vector<1x8x32xf32> to vector<8x32xf32>
    %145 = vector.shape_cast %142 : vector<8x32xf32> to vector<1x8x32xf32>
    tpu.vector_store %arg14[%c0_64, %c0_65, %c0_66], %145 {strides = array<i32>} : memref<1x8x32xf32, #tpu.memory_space<vmem>>, vector<1x8x32xf32>,
    return
  }
  func.func @transform_0(%arg0: i32) -> (i32, i32, i32) {
    %c0_i32 = arith.constant 0 : i32
    %c0_i32_0 = arith.constant 0 : i32
    %c0_i32_1 = arith.constant 0 : i32
    return %arg0, %c0_i32, %c0_i32_0 : i32, i32, i32
  }
  func.func @transform_1(%arg0: i32) -> (i32, i32) {
    %c0_i32 = arith.constant 0 : i32
    %c0_i32_0 = arith.constant 0 : i32
    %c0_i32_1 = arith.constant 0 : i32
    return %c0_i32, %c0_i32_0 : i32, i32
  }
  func.func @transform_2(%arg0: i32) -> (i32, i32) {
    %c0_i32 = arith.constant 0 : i32
    %c0_i32_0 = arith.constant 0 : i32
    %c0_i32_1 = arith.constant 0 : i32
    return %c0_i32, %c0_i32_0 : i32, i32
  }
  func.func @transform_3(%arg0: i32) -> (i32, i32) {
    %c0_i32 = arith.constant 0 : i32
    %c0_i32_0 = arith.constant 0 : i32
    %c0_i32_1 = arith.constant 0 : i32
    return %c0_i32, %c0_i32_0 : i32, i32
  }
  func.func @transform_4(%arg0: i32) -> (i32, i32) {
    %c0_i32 = arith.constant 0 : i32
    %c0_i32_0 = arith.constant 0 : i32
    %c0_i32_1 = arith.constant 0 : i32
    return %c0_i32, %c0_i32_0 : i32, i32
  }
  func.func @transform_5(%arg0: i32) -> (i32, i32) {
    %c0_i32 = arith.constant 0 : i32
    %c0_i32_0 = arith.constant 0 : i32
    %c0_i32_1 = arith.constant 0 : i32
    return %c0_i32, %c0_i32_0 : i32, i32
  }
  func.func @transform_6(%arg0: i32) -> (i32, i32) {
    %c0_i32 = arith.constant 0 : i32
    %c0_i32_0 = arith.constant 0 : i32
    %c0_i32_1 = arith.constant 0 : i32
    return %c0_i32, %c0_i32_0 : i32, i32
  }
  func.func @transform_7(%arg0: i32) -> (i32, i32) {
    %c0_i32 = arith.constant 0 : i32
    %c0_i32_0 = arith.constant 0 : i32
    %c0_i32_1 = arith.constant 0 : i32
    return %c0_i32, %c0_i32_0 : i32, i32
  }
  func.func @transform_8(%arg0: i32) -> (i32, i32) {
    %c0_i32 = arith.constant 0 : i32
    %c0_i32_0 = arith.constant 0 : i32
    %c0_i32_1 = arith.constant 0 : i32
    return %c0_i32, %c0_i32_0 : i32, i32
  }
  func.func @transform_9(%arg0: i32) -> (i32, i32) {
    %c0_i32 = arith.constant 0 : i32
    %c0_i32_0 = arith.constant 0 : i32
    %c0_i32_1 = arith.constant 0 : i32
    return %c0_i32, %c0_i32_0 : i32, i32
  }
  func.func @transform_10(%arg0: i32) -> (i32, i32) {
    %c0_i32 = arith.constant 0 : i32
    %c0_i32_0 = arith.constant 0 : i32
    %c0_i32_1 = arith.constant 0 : i32
    return %c0_i32, %c0_i32_0 : i32, i32
  }
  func.func @transform_11(%arg0: i32) -> (i32, i32) {
    %c0_i32 = arith.constant 0 : i32
    %c0_i32_0 = arith.constant 0 : i32
    %c0_i32_1 = arith.constant 0 : i32
    return %c0_i32, %c0_i32_0 : i32, i32
  }
  func.func @transform_12(%arg0: i32) -> (i32, i32) {
    %c0_i32 = arith.constant 0 : i32
    %c0_i32_0 = arith.constant 0 : i32
    %c0_i32_1 = arith.constant 0 : i32
    return %c0_i32, %c0_i32_0 : i32, i32
  }
  func.func @transform_13(%arg0: i32) -> (i32, i32, i32) {
    %c0_i32 = arith.constant 0 : i32
    %c0_i32_0 = arith.constant 0 : i32
    %c0_i32_1 = arith.constant 0 : i32
    return %arg0, %c0_i32, %c0_i32_0 : i32, i32, i32
  }
}

</mosaic_0001>

<bundles_post_ra>
// kernel: tpu_custom_call.1
= control target key start
LH: loop header
LB: loop body
LE: loop exit
PB: predicated region body
PF: predicated region fallthrough
CT: control target
= control target key end

     0   :  { %s2707_s0 = inlined_call_operand.hbm [shape: f32[2,8,32], index: 0, kind: input, shape index: {}]   ;;  %s2708_s1 = inlined_call_operand.vmem [shape: f32[32,32], index: 1, kind: input, shape index: {}]   ;;  %s2709_s2 = inlined_call_operand.vmem [shape: f32[32,32], index: 2, kind: input, shape index: {}]   ;;  %s2710_s3 = inlined_call_operand.vmem [shape: f32[32,32], index: 3, kind: input, shape index: {}]   ;;  %s2711_s4 = inlined_call_operand.hbm [shape: f32[32,32], index: 4, kind: input, shape index: {}]   ;;  %s2712_s5 = inlined_call_operand.vmem [shape: f32[1,32], index: 5, kind: input, shape index: {}]   ;;  %s2713_s6 = inlined_call_operand.vmem [shape: f32[1,32], index: 6, kind: input, shape index: {}]   ;;  %s2714_s7 = inlined_call_operand.hbm [shape: f32[32,64], index: 7, kind: input, shape index: {}]   ;;  %s2715_s8 = inlined_call_operand.vmem [shape: f32[1,64], index: 8, kind: input, shape index: {}]   ;;  %s2716_s9 = inlined_call_operand.vmem [shape: f32[64,32], index: 9, kind: input, shape index: {}]   ;;  %s2717_s10 = inlined_call_operand.vmem [shape: f32[1,32], index: 10, kind: input, shape index: {}]   ;;  %s2718_s11 = inlined_call_operand.vmem [shape: f32[1,32], index: 11, kind: input, shape index: {}]   ;;  %s2719_s12 = inlined_call_operand.vmem [shape: f32[1,32], index: 12, kind: input, shape index: {}]   ;;  %s2720_s13 = inlined_call_operand.hbm [shape: f32[2,8,32], index: 13, kind: output, shape index: {}]  }
   0x1   :  { %2731 = sst [smem:[#allocation18_spill]] %s2711_s4 }
   0x2   :  { %2732 = sst [smem:[#allocation19_spill]] %s2714_s7 }
   0x3   :  { %18 = vsyncpa [#allocation3], 0 }
   0x4   :  { %20 = vsyncpa [#allocation3 + $0x1], 0 }
   0x5   :  { %21 = vsyncpa [#allocation6], 0 }
   0x6   :  { %22 = vsyncpa [#allocation4], 0 }
   0x7   :  { %24 = vsyncpa [#allocation4 + $0x1], 0  ;;  %s2343_s25 = smov 0   ;;  %s2345_s26 = smov 0  }
   0x8   :  { %s2347_s27 = smov 0   ;;  %s2349_s28 = smov 0  }
   0x9 LB: > { %2733 = sst [smem:[#allocation12_spill]] %s2245_s25  ;;  %s2364_s29 = sadd.s32 4294967295, %s2257_s28   ;;  %s2257_s28 = sphi %s2349_s28, %s2758_s28   ;;  %s2253_s27 = sphi %s2347_s27, %s2760_s27   ;;  %s2249_s26 = sphi %s2345_s26, %s2762_s26   ;;  %s2245_s25 = sphi %s2343_s25, %s2761_s25  }
   0xa   : > { %2734 = sst [smem:[#allocation13_spill]] %s2253_s27  ;;  %s1808_s30 = sadd.s32 4294967294, %s2257_s28  }
   0xb   : > { %2735 = sst [smem:[#allocation14_spill]] %s2257_s28  ;;  %p50_p0 = scmp.ne.s32.totalorder %s2249_s26, %s2245_s25 }
   0xc   : > { %p2721_p1 = scmp.eq.s32.totalorder %s2364_s29, 0  ;;  %p332_p3 = scmp.eq.s32.totalorder %s1808_s30, 1 }
   0xd   : > { %p1809_p5 = scmp.ge.s32.totalorder %s2257_s28, 1  ;;  %p339_p7 = scmp.lt.s32.totalorder %s2257_s28, 3 }
   0xe   : > { %p2373_p4 = por %p2721_p1, %p50_p0  ;;  %p2378_p6 = por %p332_p3, %p50_p0 }
   0xf   : > { %p2383_p8 = pnand %p1809_p5, %p339_p7  ;;  %s2259_s17 = smov [#allocation5]  }
  0x10   : > { %s2736_s14 = scalar_select %p2373_p4, 1, 0 }
  0x11   : > { %s2737_s15 = scalar_select %p2378_p6, 1, 0 }
  0x12   : > { %s2739_s16 = scalar_select %p2383_p8, 1, 0 }
  0x13   : > { %2738 = sst [smem:[#allocation15_spill]] %s2737_s15  ;;  %s360_s18 = sshll.u32 %s2259_s17, 4  ;;  %s361_s18 = int_to_ptr.vmem [resolvable:$true] %s360_s18 }
  0x14   : > { %p2024_p9 = pneg %p2383_p8  ;;  %s2260_s20 = smov [#allocation7]  }
  0x15   : > { %s379_s21 = sshll.u32 %s2260_s20, 4  ;;  %s2120_s22 = scalar_lea.vmem %s361_s18, 512  ;;  %s380_s21 = int_to_ptr.vmem [resolvable:$true] %s379_s21 }
  0x16   : > { %p2392_p11 = pnand %p2024_p9, %p2721_p1  ;;  %p2121_p13 = scmp.ne.s32.totalorder %s361_s18, %s2120_s22 }
  0x17   : > { %p2128_p5 = scmp.lt.s32.totalorder %s361_s18, %s361_s18  ;;  %p2129_p7 = scmp.lt.s32.totalorder %s2120_s22, %s2120_s22 }
  0x18   : > { %p2111_p12 = pneg %p2392_p11 }
  0x19   : > { %p2130_p10 = por %p2129_p7, %p2128_p5 }
  0x1a   : > { %p2123_p0 = pnand %p2121_p13, %p2111_p12 }
  0x1c   : > { %p2124_p3 = pneg %p2123_p0 }
  0x1e   : > { %p2131_p9 = pnand %p2130_p10, %p2124_p3 }
  0x20   : > { %2134 = shalt.err (!%p2131_p9)
}
  0x21   : > { %s2261_s23 = smov 128   ;;  %s2262_s24 = smov 8  }
  0x22   : > { %s2741_s4 = sld [smem:[#allocation18_spill]]  ;;  %s2146_s20 = scalar_lea.vmem %s380_s21, 512 }
  0x23   : > { %p2147_p1 = scmp.ne.s32.totalorder %s380_s21, %s2146_s20  ;;  %p2154_p2 = scmp.lt.s32.totalorder %s380_s21, %s380_s21 }
  0x24   : > { %p2155_p6 = scmp.lt.s32.totalorder %s2146_s20, %s2146_s20 }
  0x25   : > { %p2149_p13 = pnand %p2147_p1, %p2111_p12 }
  0x26   : > { %p2156_p5 = por %p2155_p6, %p2154_p2 }
  0x27   : > { %p2150_p0 = pneg %p2149_p13 }
  0x28   : > { %2027 = dma.hbm_to_vmem [thread:$0]  (!%p2392_p11), %s2741_s4, 512, %s361_s18, [#allocation6], %s2261_s23, %s2261_s23, %s2262_s24  }
  0x29   : > { %p2157_p10 = pnand %p2156_p5, %p2150_p0 }
  0x2b   : > { %2160 = shalt.err (!%p2157_p10)
}
  0x2c   : > { %s2742_s7 = sld [smem:[#allocation19_spill]]  ;;  %s2415_s18 = sadd.s32 1, %s2257_s28  }
  0x2d   : > { %2743 = sst [smem:[#allocation16_spill]] %s2415_s18  ;;  %s37_s30 = sadd.s32 1, %s2253_s27 }
  0x2e   : > { %s34_s19 = ssub.s32 %s2257_s28, %s2415_s18  ;;  %p44_p1 = scmp.ne.s32.totalorder %s2253_s27, %s2249_s26 }
  0x2f   : > { %p35_p2 = scmp.eq.s32.totalorder %s34_s19, 0  ;;  %p45_p6 = scmp.eq.s32.totalorder %s2257_s28, 0 }
  0x30   : > { %p2744_p12 = scmp.eq.s32.totalorder %s2364_s29, 1  ;;  %p2041_p7 = scmp.lt.s32.totalorder %s2257_s28, 2 }
  0x31   : > { %s2431_s17 = scalar_select %p35_p2, %s2253_s27, %s37_s30  }
  0x32   : > { %2030 = dma.hbm_to_vmem [thread:$0]  (!%p2392_p11), %s2742_s7, 512, %s380_s21, [#allocation6], %s2261_s23, %s2261_s23, %s2262_s24  }
  0x33   : > { %p2425_p3 = por %p2744_p12, %p44_p1  ;;  %2746 = sst [smem:[#allocation17_spill]] %s2431_s17 }
  0x34   : > { %p46_p9 = por %p45_p6, %p44_p1  ;;  %s408_s20 = sand.u32 1, %s2253_s27  }
  0x35   : > { %s2745_s15 = scalar_select %p2425_p3, 1, 0 }
  0x36   : > { %s1813_s22 = sshll.u32 %s408_s20, 3  ;;  %s1814_s21 = sshll.u32 %s2257_s28, 7 }
  0x37   : > { %s2438_s4 = scalar_lea.hbm %s2707_s0, %s1814_s21  ;;  %s412_s19 = scalar_lea.vmem [#allocation2], %s1813_s22 }
  0x38   : > { %s419_s7 = sshll.u32 %s412_s19, 4  ;;  %p2440_p11 = pnand %p2041_p7, %p46_p9  ;;  %s420_s7 = int_to_ptr.vmem [resolvable:$true] %s419_s7 }
  0x39   : > { %s409_s30 = scalar_lea.sflag [#allocation3], %s408_s20  ;;  %s2161_s17 = scalar_lea.hbm %s2438_s4, 128 }
  0x3a   : > { %p2162_p13 = scmp.ne.s32.totalorder %s2438_s4, %s2161_s17  ;;  %p2163_p0 = pneg %p2440_p11 }
  0x3b   : > { %s2166_s24 = scalar_lea.hbm %s2707_s0, 256  ;;  %p2167_p1 = scmp.lt.s32.totalorder %s2438_s4, %s2707_s0 }
  0x3c   : > { %p2164_p5 = pnand %p2163_p0, %p2162_p13  ;;  %p2168_p2 = scmp.lt.s32.totalorder %s2166_s24, %s2161_s17 }
  0x3e   : > { %p2165_p10 = pneg %p2164_p5  ;;  %p2169_p6 = por %p2168_p2, %p2167_p1 }
  0x40   : > { %p2170_p12 = pnand %p2169_p6, %p2165_p10 }
  0x42   : > { %2173 = shalt.err (!%p2170_p12)
}
  0x43   : > { %s2174_s19 = scalar_lea.vmem %s420_s7, 128  ;;  %s2263_s20 = smov [#allocation2]  }
  0x44   : > { %p2175_p7 = scmp.ne.s32.totalorder %s420_s7, %s2174_s19  ;;  %s2179_s28 = sshll.u32 %s2263_s20, 4  ;;  %s2180_s28 = int_to_ptr.vmem [resolvable:$false] %s2179_s28 }
  0x45   : > { %s2181_s25 = scalar_lea.vmem %s2180_s28, 256  ;;  %p2182_p13 = scmp.lt.s32.totalorder %s420_s7, %s2180_s28 }
  0x46   : > { %p2177_p9 = pnand %p2175_p7, %p2163_p0  ;;  %p2183_p5 = scmp.lt.s32.totalorder %s2181_s25, %s2174_s19 }
  0x48   : > { %p2178_p3 = pneg %p2177_p9  ;;  %p2184_p4 = por %p2183_p5, %p2182_p13 }
  0x4a   : > { %p2185_p8 = pnand %p2184_p4, %p2178_p3 }
  0x4c   : > { %2188 = shalt.err (!%p2185_p8)
}
  0x4d   : > { %2034 = dma.hbm_to_vmem [thread:$0]  (!%p2440_p11), %s2438_s4, 128, %s420_s7, %s409_s30  }
  0x4e   : > { %p2748_p10 = scmp.ne.s32.totalorder %s2739_s16, 0 }
  0x4f   : > { %s2461_s27 = sand.u32 (!%p2748_p10), 1, %s2249_s26   ;;  %p2749_p4 = scmp.ne.s32.totalorder (!%p2748_p10), %s2736_s14, 0 }
  0x50   : > { %428 = sbr.rel (%p2748_p10) target bundleno = 2462 (0x99e), region = 72  ;;  %s1816_s17 = sshll.u32 (!%p2748_p10), %s2461_s27, 3 }
  0x51   : > { %s431_s28 = scalar_lea.sflag (!%p2748_p10), [#allocation3], %s2461_s27  ;;  %s434_s25 = scalar_lea.vmem (!%p2748_p10), [#allocation2], %s1816_s17 }
  0x55   : > { %2232 = dma.done.wait (%p2749_p4), %s431_s28, 128  }
  0x56   : > { %2234 = vsyncadd (%p2749_p4), %s431_s28, 4294967168  ;;  %p2750_p8 = scmp.eq.s32.totalorder %s2364_s29, 0 }
  0x58   : > { %2236 = dma.done.wait (%p2750_p8), [#allocation6], 1024   ;;  %p2751_p3 = pmov %p2750_p8 }
  0x59   : > { %v2264_v0 = vmov 0.0   ;;  %vm2265_vm0 = vmmov 0   ;;  %v489_v1 = vld [vmem:[%s2708_s1 + $0x18] sm:$0xff]  ;;  %v488_v2 = vld [vmem:[%s2708_s1 + $0x10] sm:$0xff]  ;;  %v487_v3 = vld [vmem:[%s2708_s1 + $0x8] sm:$0xff]  ;;  %vm490_vm1 = vcmask 261120   ;;  %v712_v27 = vlaneseq }
  0x5a   : > { %2238 = vsyncadd (%p2751_p3), [#allocation6], 4294966272  ;;  %1898 = vmatprep.subr.mxu1 %v2264_v0  ;;  %1906 = vmatprep.mubr.msk.f32.mxu1 %vm2265_vm0, %v2264_v0  ;;  %v486_v4 = vld [vmem:[%s2708_s1] sm:$0xff]  ;;  %v567_v6 = vld [vmem:[%s2709_s2 + $0x18] sm:$0xff]  ;;  %vm719_vm2 = vcmask 64512   ;;  %s2266_s19 = smov 112  }
  0x5b   : > { %1920 = vmatprep.subr.mxu0 %v2264_v0  ;;  %1928 = vmatprep.mubr.msk.f32.mxu0 %vm2265_vm0, %v2264_v0  ;;  %v2495_v5 = vld [vmem:[%s434_s25] sm:$0xff]  ;;  %v566_v7 = vld [vmem:[%s2709_s2 + $0x10] sm:$0xff]  ;;  %v641_v10 = vld [vmem:[%s2710_s3 + $0x18] sm:$0xff]  ;;  %s2267_s20 = smov 120   ;;  %s2268_s28 = smov 104   ;;  %v713_v28 = vshrl.u32 %v712_v27, 7 }
  0x5c   : > { %1899 = vmatpush3.msra.mxu1 %v489_v1  ;;  %v565_v8 = vld [vmem:[%s2709_s2 + $0x8] sm:$0xff]  ;;  %v564_v9 = vld [vmem:[%s2709_s2] sm:$0xff]  ;;  %v640_v11 = vld [vmem:[%s2710_s3 + $0x10] sm:$0xff]  ;;  %1921 = vmatpush3.msra.mxu0 %v641_v10  ;;  %v715_v29 = vand.u32 127, %v712_v27  ;;  %s2269_s25 = smov 8   ;;  %s2270_s4 = smov 16  }
  0x5d   : > { %1900 = vmatprep.subr.mxu1 %v2264_v0  ;;  %1922 = vmatprep.subr.mxu0 %v2264_v0  ;;  %v639_v12 = vld [vmem:[%s2710_s3 + $0x8] sm:$0xff]  ;;  %v638_v13 = vld [vmem:[%s2710_s3] sm:$0xff]  ;;  %s2271_s7 = smov 24   ;;  %vm1389_vm4 = vcmask 130048   ;;  %vm1391_vm5 = vcmask 195584   ;;  %vm1600_vm6 = vcmask 523264  }
  0x5e   : > { %1901 = vmatpush3.msra.mxu1 %v488_v2  ;;  %1923 = vmatpush3.msra.mxu0 %v640_v11  ;;  %vm716_vm3 = vcmp.gt.s32.totalorder %v715_v29, %v713_v28  ;;  %s1845_s14 = sshll.u32 %s2364_s29, 7  ;;  %s484_s16 = scalar_lea.vmem [#allocation8], %s1816_s17 }
  0x5f   : > { %1902 = vmatprep.subr.mxu1 %v2264_v0  ;;  %1924 = vmatprep.subr.mxu0 %v2264_v0  ;;  %v717_v30 = vsel %vm716_vm3, -1e+09, %v2264_v0  ;;  %s1719_s18 = sshll.u32 %s484_s16, 4  ;;  %s1717_s23 = scalar_lea.hbm %s2720_s13, %s1845_s14  ;;  %s1720_s18 = int_to_ptr.vmem [resolvable:$true] %s1719_s18 }
  0x60   : > { %1903 = vmatpush3.msra.mxu1 %v487_v3  ;;  %1925 = vmatpush3.msra.mxu0 %v639_v12  ;;  %s1706_s24 = scalar_lea.sflag [#allocation4], %s2461_s27  ;;  %s2189_s22 = scalar_lea.vmem %s1720_s18, 128 }
  0x61   : > { %1904 = vmatprep.subr.mxu1 %v2264_v0  ;;  %1926 = vmatprep.subr.mxu0 %v2264_v0  ;;  %p2190_p11 = scmp.ne.s32.totalorder %s1720_s18, %s2189_s22  ;;  %p2752_p0 = scmp.ne.s32.totalorder %s2745_s15, 0 }
  0x62   : > { %1905 = vmatpush3.msra.mxu1 %v486_v4  ;;  %1927 = vmatpush3.msra.mxu0 %v638_v13 }
  0x63   : > { %1907 = vmatmul.mubr.msk.f32.vlgmr.msra.gmra.mxu1 %vm490_vm1, %v2495_v5  ;;  %1909 = vmatprep.subr.mxu1 %v2264_v0  ;;  %p2191_p1 = pnand %p2190_p11, %p2752_p0 }
  0x64   : > { %1910 = vmatpush3.msra.mxu1 %v567_v6  ;;  %1917 = vmatprep.mubr.msk.f32.mxu1 %vm2265_vm0, %v2264_v0 }
  0x65   : > { %1911 = vmatprep.subr.mxu1 %v2264_v0  ;;  %1929 = vmatmul.mubr.msk.f32.vlgmr.msra.gmra.mxu0 %vm490_vm1, %v2495_v5  ;;  %p2192_p2 = pneg %p2191_p1 }
  0x66   : > { %1912 = vmatpush3.msra.mxu1 %v566_v7  ;;  %1941 = vmatprep.subr.mxu0 %v2264_v0 }
  0x67   : > { %1913 = vmatprep.subr.mxu1 %v2264_v0  ;;  %1943 = vmatprep.mubr.msk.f32.mxu0 %vm2265_vm0, %v2264_v0 }
  0x68   : > { %1914 = vmatpush3.msra.mxu1 %v565_v8 }
  0x69   : > { %1915 = vmatprep.subr.mxu1 %v2264_v0 }
  0x6a   : > { %1916 = vmatpush3.msra.mxu1 %v564_v9 }
  0x6b   : > { %1918 = vmatmul.mubr.msk.f32.vlgmr.msra.gmra.mxu1 %vm490_vm1, %v2495_v5  ;;  %1931 = vmatprep.subr.mxu1 %v2264_v0 }
  0x6c   : > { %1933 = vmatprep.mubr.msk.f32.mxu1 %vm2265_vm0, %v2264_v0 }
 0x123   : > { %v560_v14 = vpop.f32.mrf.mxu1 }
 0x124   : > { %v718_v18 = vmul.f32 0.35355338, %v560_v14 }
 0x125   : > { %v1908_v15 = vpop.f32.mrf.mxu1  ;;  %v2554_v19 = vpop.f32.mrf.mxu0 }
 0x127   : > { %v1930_v20 = vpop.f32.mrf.mxu0 }
 0x12b   : > { %v634_v16 = vpop.f32.mrf.mxu1 }
 0x12c   : > { %1048 = vrot.lane.b32.xlu1 %v634_v16, %s2266_s19  ;;  %882 = vrot.lane.b32.xlu0 %v634_v16, %s2267_s20 }
 0x12d   : > { %1932 = vmatpush3.xpose.msk.msra.mxu1 %vm719_vm2, %v634_v16  ;;  %v1919_v17 = vpop.f32.mrf.mxu1 }
 0x12e   : > { %1936 = vmatprep.subr.mxu1 %v2264_v0 }
 0x130   : > { %1934 = vmatmul.mubr.msk.f32.vlgmr.msra.gmra.mxu1 %vm719_vm2, %v718_v18  ;;  %1046 = vrot.lane.b32.xlu1 %v718_v18, %s2266_s19 }
 0x131   : > { %880 = vrot.lane.b32.xlu0 %v718_v18, %s2267_s20  ;;  %1938 = vmatprep.mubr.msk.f32.mxu1 %vm2265_vm0, %v2264_v0 }
 0x132   : > { %1937 = vmatpush3.msra.mxu1 %v2554_v19 }
 0x133   : > { %1946 = vmatprep.subr.mxu1 %v2264_v0 }
 0x134   : > { %1211 = vrot.lane.b32.xlu1 %v718_v18, %s2268_s28 }
 0x135   : > { %1213 = vrot.lane.b32.xlu0 %v634_v16, %s2268_s28 }
 0x19e   : > { %v883_v21 = vpop.permute.xlu0 %882  ;;  %v1049_v22 = vpop.permute.xlu1 %1048 }
 0x19f   : > { %1942 = vmatpush3.xpose.msk.msra.mxu0 %vm719_vm2, %v883_v21 }
 0x1a0   : > { %1951 = vmatprep.subr.mxu0 %v2264_v0 }
 0x1a2   : > { %v1047_v24 = vpop.permute.xlu1 %1046 }
 0x1a3   : > { %v881_v23 = vpop.permute.xlu0 %880 }
 0x1a4   : > { %1944 = vmatmul.mubr.msk.f32.vlgmr.msra.gmra.mxu0 %vm719_vm2, %v881_v23  ;;  %v1395_v23 = vld [vmem:[#allocation5 + $0x10] sm:$0xff] }
 0x1a5   : > { %1952 = vmatpush3.xpose.msk.msra.mxu0 %vm719_vm2, %v1049_v22  ;;  %1953 = vmatprep.mubr.msk.f32.mxu0 %vm2265_vm0, %v2264_v0  ;;  %v1396_v22 = vld [vmem:[#allocation5 + $0x18] sm:$0xff] }
 0x1a6   : > { %1961 = vmatprep.subr.mxu0 %v2264_v0  ;;  %v1212_v26 = vpop.permute.xlu1 %1211 }
 0x1a7   : > { %v1214_v25 = vpop.permute.xlu0 %1213 }
 0x1a8   : > { %1954 = vmatmul.mubr.msk.f32.vlgmr.msra.gmra.mxu0 %vm719_vm2, %v1047_v24  ;;  %v1394_v24 = vld [vmem:[#allocation5 + $0x8] sm:$0xff] }
 0x1a9   : > { %1962 = vmatpush3.xpose.msk.msra.mxu0 %vm719_vm2, %v1214_v25  ;;  %1963 = vmatprep.mubr.msk.f32.mxu0 %vm2265_vm0, %v2264_v0  ;;  %v1393_v25 = vld [vmem:[#allocation5] sm:$0xff] }
 0x1aa   : > { %1971 = vmatprep.subr.mxu0 %v2264_v0 }
 0x1ac   : > { %1964 = vmatmul.mubr.msk.f32.vlgmr.msra.gmra.mxu0 %vm719_vm2, %v1212_v26 }
 0x1ad   : > { %1979 = vmatprep.mubr.msk.f32.mxu0 %vm2265_vm0, %v2264_v0  ;;  %1972 = vmatpush3.msra.mxu0 %v1396_v22 }
 0x1ae   : > { %1973 = vmatprep.subr.mxu0 %v2264_v0 }
 0x1af   : > { %1974 = vmatpush3.msra.mxu0 %v1395_v23 }
 0x1b0   : > { %1975 = vmatprep.subr.mxu0 %v2264_v0 }
 0x1b1   : > { %1976 = vmatpush3.msra.mxu0 %v1394_v24  ;;  %v1842_v24 = vld [vmem:[%s2718_s11] ss:$0 sm:$0xff] }
 0x1b2   : > { %1977 = vmatprep.subr.mxu0 %v2264_v0 }
 0x1b3   : > { %1978 = vmatpush3.msra.mxu0 %v1393_v25 }
 0x1b4   : > { %1993 = vmatprep.subr.mxu0 %v2264_v0 }
 0x1f0   : > { %v792_v31 = vpop.f32.mrf.mxu1 }
 0x1f1   : > { %v793_v32 = vadd.f32 %v792_v31, %v717_v30 }
 0x1f2   : > { %v1935_v33 = vpop.f32.mrf.mxu1 }
 0x1f3   : > { %v796_v34 = vsel %vm719_vm2, %v793_v32, -inf }
 0x1f4   : > { %797 = vmax.xlane.f32.xlu0 %v796_v34 }
 0x264   : > { %v954_v35 = vpop.f32.mrf.mxu0 }
 0x265   : > { %v955_v36 = vadd.f32 %v954_v35, %v717_v30 }
 0x266   : > { %v1945_v37 = vpop.f32.mrf.mxu0 }
 0x267   : > { %v958_v38 = vsel %vm719_vm2, %v955_v36, -inf }
 0x268   : > { %959 = vmax.xlane.f32.xlu1 %v958_v38  ;;  %v1120_v39 = vpop.f32.mrf.mxu0 }
 0x269   : > { %v1121_v40 = vadd.f32 %v1120_v39, %v717_v30 }
 0x26a   : > { %v1955_v41 = vpop.f32.mrf.mxu0 }
 0x26b   : > { %v1124_v42 = vsel %vm719_vm2, %v1121_v40, -inf }
 0x26c   : > { %v1285_v43 = vpop.f32.mrf.mxu0  ;;  %1125 = vmax.xlane.f32.xlu0 %v1124_v42 }
 0x26d   : > { %v1286_v44 = vadd.f32 %v1285_v43, %v717_v30 }
 0x26e   : > { %v1965_v45 = vpop.f32.mrf.mxu0 }
 0x26f   : > { %v1289_v46 = vsel %vm719_vm2, %v1286_v44, -inf }
 0x270   : > { %1290 = vmax.xlane.f32.xlu0 %v1289_v46 }
 0x279   : > { %970 = vrot.lane.b32.xlu1 %v2554_v19, %s2267_s20 }
 0x27d   : > { %v798_v47 = vpop.xlane.xlu0 %797 }
 0x27e   : > { %v799_v48 = vsub.f32 %v793_v32, %v798_v47  ;;  %v1503_v47 = vld [vmem:[#allocation7 + $0x18] sm:$0xff] }
 0x280   : > { %v800_v49 = vmul.f32 1.442695, %v799_v48  ;;  %v1502_v48 = vld [vmem:[#allocation7 + $0x10] sm:$0xff] }
 0x282   : > { %2089 = vpow2.f32 %v800_v49  ;;  %v1501_v49 = vld [vmem:[#allocation7 + $0x8] sm:$0xff] }
 0x28f   : > { %v2090_v50 = vpop.eup %2089 }
 0x290   : > { %v802_v51 = vsel %vm719_vm2, %v2090_v50, 0.0 }
 0x29d   : > { %803 = vadd.xlane.f32.xlu1 %v802_v51  ;;  %v1591_v51 = vld [vmem:[%s2716_s9 + $0x30] sm:$0xff] }
 0x2f1   : > { %v960_v52 = vpop.xlane.xlu1 %959 }
 0x2f2   : > { %v961_v53 = vsub.f32 %v955_v36, %v960_v52  ;;  %v1590_v52 = vld [vmem:[%s2716_s9 + $0x28] sm:$0xff] }
 0x2f4   : > { %v962_v54 = vmul.f32 1.442695, %v961_v53  ;;  %v1589_v53 = vld [vmem:[%s2716_s9 + $0x20] sm:$0xff] }
 0x2f5   : > { %v1126_v55 = vpop.xlane.xlu0 %1125  ;;  %v971_v4 = vpop.permute.xlu1 %970 }
 0x2f6   : > { %2091 = vpow2.f32 %v962_v54  ;;  %v1127_v56 = vsub.f32 %v1121_v40, %v1126_v55  ;;  %v1588_v54 = vld [vmem:[%s2716_s9 + $0x18] sm:$0xff] }
 0x2f8   : > { %v1128_v57 = vmul.f32 1.442695, %v1127_v56 }
 0x2f9   : > { %v1291_v58 = vpop.xlane.xlu0 %1290 }
 0x2fa   : > { %2093 = vpow2.f32 %v1128_v57  ;;  %v1292_v59 = vsub.f32 %v1286_v44, %v1291_v58 }
 0x2fc   : > { %v1293_v60 = vmul.f32 1.442695, %v1292_v59  ;;  %v1836_v59 = vld [vmem:[%s2712_s5] ss:$0 sm:$0xff] }
 0x2fe   : > { %2095 = vpow2.f32 %v1293_v60 }
 0x303   : > { %v2092_v61 = vpop.eup %2091 }
 0x304   : > { %v964_v62 = vsel %vm719_vm2, %v2092_v61, 0.0 }
 0x305   : > { %965 = vadd.xlane.f32.xlu0 %v964_v62 }
 0x307   : > { %v2094_v63 = vpop.eup %2093 }
 0x308   : > { %v1130_v1 = vsel %vm719_vm2, %v2094_v63, 0.0 }
 0x309   : > { %1131 = vadd.xlane.f32.xlu1 %v1130_v1  ;;  %v1587_v1 = vld [vmem:[%s2716_s9 + $0x10] sm:$0xff] }
 0x30b   : > { %v2096_v2 = vpop.eup %2095 }
 0x30c   : > { %v1295_v3 = vsel %vm719_vm2, %v2096_v2, 0.0 }
 0x30d   : > { %1296 = vadd.xlane.f32.xlu0 %v1295_v3  ;;  %v1585_v3 = vld [vmem:[%s2716_s9] sm:$0xff] }
 0x31a   : > { %1300 = vrot.lane.b32.xlu1 %v2554_v19, %s2268_s28 }
 0x323   : > { %1135 = vrot.lane.b32.xlu0 %v2554_v19, %s2266_s19  ;;  %s2272_s19 = smov [#allocation8]  }
 0x324   : > { %s2193_s29 = sshll.u32 %s2272_s19, 4  ;;  %s2194_s29 = int_to_ptr.vmem [resolvable:$false] %s2193_s29 }
 0x325   : > { %s2195_s17 = scalar_lea.vmem %s2194_s29, 256  ;;  %p2196_p6 = scmp.lt.s32.totalorder %s1720_s18, %s2194_s29 }
 0x326   : > { %v804_v6 = vpop.xlane.xlu1 %803  ;;  %p2197_p12 = scmp.lt.s32.totalorder %s2195_s17, %s2189_s22 }
 0x327   : > { %2097 = vrcp.f32 %v804_v6 }
 0x328   : > { %p2198_p7 = por %p2197_p12, %p2196_p6 }
 0x32a   : > { %p2199_p9 = pnand %p2198_p7, %p2192_p2 }
 0x334   : > { %v2098_v7 = vpop.eup %2097 }
 0x335   : > { %v806_v8 = vmul.f32 %v2098_v7, %v2090_v50  ;;  %v1592_v50 = vld [vmem:[%s2716_s9 + $0x38] sm:$0xff] }
 0x337   : > { %1939 = vmatmul.mubr.msk.f32.vlgmr.msra.gmra.mxu1 %vm719_vm2, %v806_v8 }
 0x338   : > { %1947 = vmatpush3.msra.mxu1 %v971_v4  ;;  %1948 = vmatprep.mubr.msk.f32.mxu1 %vm2265_vm0, %v2264_v0  ;;  %v1838_v4 = vld [vmem:[%s2715_s8] ss:$0 sm:$0xff] }
 0x339   : > { %1956 = vmatprep.subr.mxu1 %v2264_v0 }
 0x38e   : > { %v966_v9 = vpop.xlane.xlu0 %965 }
 0x38f   : > { %2099 = vrcp.f32 %v966_v9 }
 0x392   : > { %v1132_v10 = vpop.xlane.xlu1 %1131 }
 0x393   : > { %2101 = vrcp.f32 %v1132_v10  ;;  %v1840_v10 = vld [vmem:[%s2717_s10] ss:$0 sm:$0xff] }
 0x396   : > { %v1297_v11 = vpop.xlane.xlu0 %1296  ;;  %v1301_v17 = vpop.permute.xlu1 %1300 }
 0x397   : > { %2103 = vrcp.f32 %v1297_v11 }
 0x39a   : > { %v1136_v14 = vpop.permute.xlu0 %1135 }
 0x39c   : > { %v2100_v12 = vpop.eup %2099 }
 0x39d   : > { %v968_v13 = vmul.f32 %v2100_v12, %v2092_v61  ;;  %v1837_v61 = vld [vmem:[%s2713_s6] ss:$0 sm:$0xff] }
 0x39f   : > { %1949 = vmatmul.mubr.msk.f32.vlgmr.msra.gmra.mxu1 %vm719_vm2, %v968_v13 }
 0x3a0   : > { %v2102_v15 = vpop.eup %2101  ;;  %1957 = vmatpush3.msra.mxu1 %v1136_v14  ;;  %1958 = vmatprep.mubr.msk.f32.mxu1 %vm2265_vm0, %v2264_v0 }
 0x3a1   : > { %1966 = vmatprep.subr.mxu1 %v2264_v0  ;;  %v1134_v16 = vmul.f32 %v2102_v15, %v2094_v63 }
 0x3a3   : > { %1959 = vmatmul.mubr.msk.f32.vlgmr.msra.gmra.mxu1 %vm719_vm2, %v1134_v16 }
 0x3a4   : > { %v2104_v18 = vpop.eup %2103  ;;  %1967 = vmatpush3.msra.mxu1 %v1301_v17  ;;  %1968 = vmatprep.mubr.msk.f32.mxu1 %vm2265_vm0, %v2264_v0 }
 0x3a5   : > { %v1299_v19 = vmul.f32 %v2104_v18, %v2096_v2  ;;  %1982 = vmatprep.subr.mxu1 %v2264_v0  ;;  %v1586_v2 = vld [vmem:[%s2716_s9 + $0x8] sm:$0xff] }
 0x3a7   : > { %1969 = vmatmul.mubr.msk.f32.vlgmr.msra.gmra.mxu1 %vm719_vm2, %v1299_v19 }
 0x3a8   : > { %1990 = vmatprep.mubr.msk.f32.mxu1 %vm2265_vm0, %v2264_v0  ;;  %1983 = vmatpush3.msra.mxu1 %v1503_v47 }
 0x3a9   : > { %1984 = vmatprep.subr.mxu1 %v2264_v0 }
 0x3aa   : > { %1985 = vmatpush3.msra.mxu1 %v1502_v48 }
 0x3ab   : > { %1986 = vmatprep.subr.mxu1 %v2264_v0 }
 0x3ac   : > { %1987 = vmatpush3.msra.mxu1 %v1501_v49 }
 0x3ad   : > { %1988 = vmatprep.subr.mxu1 %v2264_v0 }
 0x3f7   : > { %v876_v20 = vpop.f32.mrf.mxu1 }
 0x3f9   : > { %v1940_v21 = vpop.f32.mrf.mxu1 }
 0x45f   : > { %v1042_v26 = vpop.f32.mrf.mxu1 }
 0x460   : > { %1377 = vrot.lane.b32.xlu1 %v1042_v26, %s2269_s25  ;;  %v1843_v26 = vld [vmem:[%s2719_s12] ss:$0 sm:$0xff] }
 0x461   : > { %v1950_v27 = vpop.f32.mrf.mxu1 }
 0x463   : > { %v1207_v28 = vpop.f32.mrf.mxu1 }
 0x464   : > { %1381 = vrot.lane.b32.xlu0 %v1207_v28, %s2270_s4 }
 0x465   : > { %v1960_v29 = vpop.f32.mrf.mxu1 }
 0x467   : > { %v1372_v30 = vpop.f32.mrf.mxu1 }
 0x468   : > { %1385 = vrot.lane.b32.xlu1 %v1372_v30, %s2271_s7 }
 0x469   : > { %v1970_v31 = vpop.f32.mrf.mxu1 }
 0x4d2   : > { %v1378_v32 = vpop.permute.xlu1 %1377 }
 0x4d3   : > { %v1388_v34 = vsel %vm719_vm2, %v876_v20, %v1378_v32 }
 0x4d6   : > { %v1382_v33 = vpop.permute.xlu0 %1381 }
 0x4d7   : > { %v1390_v35 = vsel %vm1389_vm4, %v1388_v34, %v1382_v33 }
 0x4da   : > { %v1386_v36 = vpop.permute.xlu1 %1385 }
 0x4db   : > { %v1392_v37 = vsel %vm1391_vm5, %v1390_v35, %v1386_v36 }
 0x4dc   : > { %1980 = vmatmul.mubr.msk.f32.vlgmr.msra.gmra.mxu0 %vm490_vm1, %v1392_v37 }
 0x4dd   : > { %2009 = vmatprep.mubr.msk.f32.mxu0 %vm2265_vm0, %v2264_v0  ;;  %1994 = vmatpush3.msra.mxu0 %v1592_v50 }
 0x4de   : > { %1995 = vmatprep.subr.mxu0 %v2264_v0 }
 0x4df   : > { %1996 = vmatpush3.msra.mxu0 %v1591_v51 }
 0x4e0   : > { %1997 = vmatprep.subr.mxu0 %v2264_v0 }
 0x4e1   : > { %1998 = vmatpush3.msra.mxu0 %v1590_v52 }
 0x4e2   : > { %1999 = vmatprep.subr.mxu0 %v2264_v0 }
 0x4e3   : > { %2000 = vmatpush3.msra.mxu0 %v1589_v53 }
 0x4e4   : > { %2001 = vmatprep.subr.mxu0 %v2264_v0 }
 0x4e5   : > { %2002 = vmatpush3.msra.mxu0 %v1588_v54 }
 0x4e6   : > { %2003 = vmatprep.subr.mxu0 %v2264_v0 }
 0x4e7   : > { %2004 = vmatpush3.msra.mxu0 %v1587_v1 }
 0x4e8   : > { %2005 = vmatprep.subr.mxu0 %v2264_v0 }
 0x4e9   : > { %2006 = vmatpush3.msra.mxu0 %v1586_v2 }
 0x4ea   : > { %2007 = vmatprep.subr.mxu0 %v2264_v0 }
 0x4eb   : > { %2008 = vmatpush3.msra.mxu0 %v1585_v3 }
 0x59c   : > { %v1466_v38 = vpop.f32.mrf.mxu0 }
 0x59d   : > { %v1467_v39 = vadd.f32 %v1466_v38, %v2495_v5  ;;  %v1500_v5 = vld [vmem:[#allocation7] sm:$0xff] }
 0x59e   : > { %v1981_v40 = vpop.f32.mrf.mxu0  ;;  %1989 = vmatpush3.msra.mxu1 %v1500_v5 }
 0x59f   : > { %v1472_v41 = vsel %vm490_vm1, %v1467_v39, 0.0 }
 0x5a0   : > { %1473 = vadd.xlane.f32.xlu0 %v1472_v41 }
 0x629   : > { %v1474_v42 = vpop.xlane.xlu0 %1473 }
 0x62a   : > { %v1476_v43 = vmul.f32 0.03125, %v1474_v42 }
 0x62c   : > { %v1477_v44 = vsub.f32 %v1467_v39, %v1476_v43 }
 0x62e   : > { %v1478_v45 = vmul.f32 %v1477_v44, %v1477_v44 }
 0x630   : > { %v1479_v46 = vsel %vm490_vm1, %v1478_v45, 0.0 }
 0x631   : > { %1480 = vadd.xlane.f32.xlu1 %v1479_v46 }
 0x6ba   : > { %v1481_v55 = vpop.xlane.xlu1 %1480 }
 0x6bb   : > { %v1482_v56 = vmul.f32 0.03125, %v1481_v55 }
 0x6bd   : > { %v1483_v57 = vadd.f32 1e-06, %v1482_v56 }
 0x6bf   : > { %2105 = vrsqrt.f32 %v1483_v57 }
 0x6cc   : > { %v2106_v58 = vpop.eup %2105 }
 0x6cd   : > { %v1485_v60 = vmul.f32 %v2106_v58, %v1477_v44 }
 0x6cf   : > { %v1492_v62 = vmul.f32 %v1836_v59, %v1485_v60 }
 0x6d1   : > { %v1499_v63 = vadd.f32 %v1837_v61, %v1492_v62 }
 0x6d3   : > { %1991 = vmatmul.mubr.msk.f32.vlgmr.msra.gmra.mxu1 %vm490_vm1, %v1499_v63 }
 0x793   : > { %v1580_v6 = vpop.f32.mrf.mxu1 }
 0x794   : > { %v1581_v7 = vadd.f32 %v1838_v4, %v1580_v6 }
 0x795   : > { %v1992_v8 = vpop.f32.mrf.mxu1 }
 0x796   : > { %v1584_v9 = vmax.f32 %v1581_v7, 0.0 }
 0x798   : > { %2010 = vmatmul.mubr.msk.f32.vlgmr.msra.gmra.mxu0 %vm1600_vm6, %v1584_v9 }
 0x858   : > { %v1670_v11 = vpop.f32.mrf.mxu0 }
 0x859   : > { %v1671_v12 = vadd.f32 %v1840_v10, %v1670_v11 }
 0x85a   : > { %v2011_v13 = vpop.f32.mrf.mxu0 }
 0x85b   : > { %v1674_v14 = vadd.f32 %v1671_v12, %v1499_v63 }
 0x85d   : > { %v1677_v0 = vsel %vm490_vm1, %v1674_v14, 0.0 }
 0x85e   : > { %1678 = vadd.xlane.f32.xlu0 %v1677_v0 }
 0x8e7   : > { %v1679_v15 = vpop.xlane.xlu0 %1678 }
 0x8e8   : > { %v1680_v16 = vmul.f32 0.03125, %v1679_v15 }
 0x8ea   : > { %v1681_v17 = vsub.f32 %v1674_v14, %v1680_v16 }
 0x8ec   : > { %v1682_v18 = vmul.f32 %v1681_v17, %v1681_v17 }
 0x8ee   : > { %v1683_v19 = vsel %vm490_vm1, %v1682_v18, 0.0 }
 0x8ef   : > { %1684 = vadd.xlane.f32.xlu0 %v1683_v19 }
 0x978   : > { %v1685_v20 = vpop.xlane.xlu0 %1684 }
 0x979   : > { %v1686_v21 = vmul.f32 0.03125, %v1685_v20 }
 0x97b   : > { %v1687_v22 = vadd.f32 1e-06, %v1686_v21 }
 0x97d   : > { %2107 = vrsqrt.f32 %v1687_v22 }
 0x98a   : > { %v2108_v23 = vpop.eup %2107 }
 0x98b   : > { %v1689_v25 = vmul.f32 %v2108_v23, %v1681_v17 }
 0x98d   : > { %v1696_v27 = vmul.f32 %v1842_v24, %v1689_v25 }
 0x98f   : > { %v1703_v28 = vadd.f32 %v1843_v26, %v1696_v27 }
 0x991   : > { %1704 = vst.msk [vmem:[%s484_s16] sm:$0xff] %vm490_vm1, %v1703_v28 }
 0x992   : > { %2202 = shalt.err (!%p2199_p9)
}
 0x993   : > { %s2203_s20 = scalar_lea.hbm %s1717_s23, 128  ;;  %s2207_s25 = scalar_lea.hbm %s2720_s13, 256 }
 0x994   : > { %p2204_p13 = scmp.ne.s32.totalorder %s1717_s23, %s2203_s20  ;;  %p2208_p4 = scmp.lt.s32.totalorder %s1717_s23, %s2720_s13 }
 0x995   : > { %p2209_p8 = scmp.lt.s32.totalorder %s2207_s25, %s2203_s20 }
 0x996   : > { %p2205_p5 = pnand %p2204_p13, %p2752_p0 }
 0x997   : > { %p2210_p3 = por %p2209_p8, %p2208_p4 }
 0x998   : > { %p2206_p10 = pneg %p2205_p5 }
 0x99a   : > { %p2211_p11 = pnand %p2210_p3, %p2206_p10 }
 0x99c   : > { %2214 = shalt.err (!%p2211_p11)
}
 0x99d   : > { %2022 = dma.vmem_to_hbm [thread:$0]  (%p2752_p0), %s1720_s18, 128, %s1717_s23, %s1706_s24  }
 0x99e PF: > { %s2753_s14 = sld [smem:[#allocation12_spill]] }
 0x99f   : > { %s2754_s16 = sld [smem:[#allocation15_spill]] }
 0x9a0   : > { %s2755_s30 = sld [smem:[#allocation14_spill]] }
 0x9a4   : > { %s1731_s21 = sand.u32 1, %s2753_s14  }
 0x9a5   : > { %p2756_p1 = scmp.ne.s32.totalorder %s2754_s16, 0  ;;  %s1732_s22 = scalar_lea.sflag [#allocation4], %s1731_s21 }
 0x9a6   : > { %p2757_p2 = scmp.ge.s32.totalorder %s2755_s30, 2 }
 0x9a8   : > { %p2036_p6 = pnand %p2757_p2, %p2756_p1 }
 0x9aa   : > { %p2037_p12 = pneg %p2036_p6 }
 0x9ac   : > { %2240 = dma.done.wait (%p2037_p12), %s1732_s22, 128  }
 0x9ad   : > { %2242 = vsyncadd (%p2037_p12), %s1732_s22, 4294967168  ;;  %s2758_s28 = sld [smem:[#allocation16_spill]]  ;;  %s2761_s25 = smov %s2249_s26 }
 0x9ae   : > { %s2759_s19 = sld [smem:[#allocation13_spill]] }
 0x9af   : > { %s2760_s27 = sld [smem:[#allocation17_spill]] }
 0x9b3   : > { %p27_p7 = scmp.ge.s32.totalorder %s2758_s28, 4  }
 0x9b4   : > { %s2762_s26 = smov %s2759_s19 }
 0x9b5   :  { %29 = sbr.rel (!%p27_p7) target bundleno = 9 (0x9), region = 125 }
 0x9ba   :  { %1737 = vsyncpa [#allocation3], 1 }
 0x9bb   :  { %1739 = vsyncpa [#allocation3 + $0x1], 1 }
 0x9bc   :  { %1740 = vsyncpa [#allocation6], 1 }
 0x9bd   :  { %1741 = vsyncpa [#allocation4], 1 }
 0x9be   :  { %1743 = vsyncpa [#allocation4 + $0x1], 1 }

</bundles_post_ra>
